<compile_context>
chip_gen: v7x
topology: tpu7x:2x2x1
jax: 0.10.0
libtpu: 0.0.40
codegen_flags: <defaults>
</compile_context>

<pallas_src>
import jax
import jax.numpy as jnp
from jax.experimental import pallas as pl
from jax.experimental.pallas import tpu as pltpu


def policy_kernel(x_ref, w1_ref, b1_ref, w2_ref, b2_ref, o_ref):
    # x: [TB, F] f32/bf16; w1: [F, H] bf16; b1: [1, H] f32;
    # w2: [H, A] bf16;  b2: [1, A] f32;  o: [TB, A] f32 log-probs.
    x = x_ref[...].astype(jnp.bfloat16)

    # linear1 + relu (bf16 x bf16 on the MXU, f32 accumulate, f32 bias add)
    h = jnp.dot(x, w1_ref[...], preferred_element_type=jnp.float32)
    h = h + b1_ref[...]
    h = jnp.maximum(h, 0.0)

    # linear2
    logits = jnp.dot(h.astype(jnp.bfloat16), w2_ref[...],
                     preferred_element_type=jnp.float32)
    logits = logits + b2_ref[...]

    # log_softmax over the action (lane) axis == PyTorch LogSoftmax(dim=0) on
    # the 1D output of a single flattened state.
    m = jnp.max(logits, axis=-1, keepdims=True)
    s = logits - m
    lse = jnp.log(jnp.sum(jnp.exp(s), axis=-1, keepdims=True))
    o_ref[...] = (s - lse).astype(o_ref.dtype)


def prepare_params(w1, b1, w2, b2, weight_dtype=jnp.bfloat16):
    """Cast weights to bf16 MXU operands; keep biases as tiny f32 row refs.

    w1: [F, H] (pre-transposed from PyTorch's [H, F]), b1: [H]
    w2: [H, A],                                        b2: [A]
    """
    return (w1.astype(weight_dtype),
            b1.reshape(1, -1).astype(jnp.float32),
            w2.astype(weight_dtype),
            b2.reshape(1, -1).astype(jnp.float32))


def _round_up(n, m):
    return ((n + m - 1) // m) * m


def policy_forward_batch(states, w1, b1, w2, b2, *, max_block_b=512):
    """states: [B, F] (each row a flattened state). Returns [B, A] log-probs."""
    b, f = states.shape
    hdim = w1.shape[1]
    a = w2.shape[1]
    assert w1.shape == (f, hdim) and w2.shape == (hdim, a)
    assert b1.shape == (1, hdim) and b2.shape == (1, a)

    # Accept f32 or bf16 states directly; anything else gets one cast.
    if states.dtype not in (jnp.float32, jnp.bfloat16):
        states = states.astype(jnp.float32)

    # Tile selection: whole batch as a single block when it fits, else
    # max_block_b-row tiles over a "parallel" batch axis.
    if b <= max_block_b:
        tile = max(_round_up(b, 8), 8)
        b_pad = tile
    else:
        tile = max_block_b
        b_pad = _round_up(b, tile)

    x = states
    if b_pad != b:
        # Pad only when ragged; padded rows are zeros (finite log-softmax) and
        # are dropped on return.
        x = jnp.pad(x, ((0, b_pad - b), (0, 0)))

    nblocks = b_pad // tile
    sem = ("parallel",) if nblocks > 1 else ("arbitrary",)

    bytes_accessed = (b_pad * f * x.dtype.itemsize        # x
                      + (f * hdim + hdim * a) * 2         # bf16 weights
                      + (hdim + a) * 4                     # f32 biases
                      + b_pad * a * 4)                     # f32 output

    out = pl.pallas_call(
        policy_kernel,
        out_shape=jax.ShapeDtypeStruct((b_pad, a), jnp.float32),
        grid=(nblocks,),
        in_specs=[
            pl.BlockSpec((tile, f), lambda i: (i, 0)),     # x batch tile
            pl.BlockSpec((f, hdim), lambda i: (0, 0)),     # W1 (resident)
            pl.BlockSpec((1, hdim), lambda i: (0, 0)),     # b1 (resident)
            pl.BlockSpec((hdim, a), lambda i: (0, 0)),     # W2 (resident)
            pl.BlockSpec((1, a), lambda i: (0, 0)),        # b2 (resident)
        ],
        out_specs=pl.BlockSpec((tile, a), lambda i: (i, 0)),
        compiler_params=pltpu.CompilerParams(dimension_semantics=sem),
        cost_estimate=pl.CostEstimate(
            flops=2 * b_pad * (f * hdim + hdim * a),
            transcendentals=b_pad * (a + 1),
            bytes_accessed=bytes_accessed),
    )(x, w1, b1, w2, b2)
    return out[:b]


def policy_forward(state, w1, b1, w2, b2):
    """Single-state forward, matching PolicyNetwork.forward(state.view(-1)).

    For rollout-loop latency, prefer batching env states through
    policy_forward_batch (B=1 is pure launch overhead for a custom call).
    """
    f = w1.shape[0]
    x = state.reshape(1, f)
    return policy_forward_batch(x, w1, b1, w2, b2)[0]


def init_linear_params(key, fan_in, fan_out):
    """Deterministic init mimicking nn.Linear: U(-1/sqrt(fan_in), 1/sqrt(fan_in))."""
    kw, kb = jax.random.split(key)
    bound = 1.0 / jnp.sqrt(float(fan_in))
    # stored already transposed: [fan_in, fan_out]
    w = jax.random.uniform(kw, (fan_in, fan_out), jnp.float32, -bound, bound)
    b = jax.random.uniform(kb, (fan_out,), jnp.float32, -bound, bound)
    return w, b


def _reference_forward(states, w1, b1, w2, b2):
    """Pure-JAX reference applying the same bf16 operand rounding, f32 math."""
    x = states.astype(jnp.bfloat16).astype(jnp.float32)
    w1f = w1.astype(jnp.float32)
    w2f = w2.astype(jnp.float32)
    h = jnp.maximum(x @ w1f + b1.astype(jnp.float32), 0.0)
    h = h.astype(jnp.bfloat16).astype(jnp.float32)
    logits = h @ w2f + b2.astype(jnp.float32)
    return jax.nn.log_softmax(logits, axis=-1)


if __name__ == "__main__":
    # Small, module-consistent shapes: state flattens to in_features=32,
    # hidden_size=32, num_actions=8.
    in_features = 32
    hidden_size = 32
    num_actions = 8

    key = jax.random.PRNGKey(0)
    k_state, k_batch, k_big, k_l1, k_l2 = jax.random.split(key, 5)

    # Single state: a [4, 8] observation grid -> view(-1) gives 32 features.
    state = jax.random.normal(k_state, (4, 8), jnp.float32)
    # Small aligned batch (single block, no pad copy) and a larger ragged batch
    # (two 512-row "parallel" tiles, pad only on the tail).
    batch_states = jax.random.normal(k_batch, (16, in_features), jnp.float32)
    big_states = jax.random.normal(k_big, (600, in_features), jnp.float32)

    w1_f32, b1_f32 = init_linear_params(k_l1, in_features, hidden_size)   # linear1
    w2_f32, b2_f32 = init_linear_params(k_l2, hidden_size, num_actions)  # linear2
    w1, b1, w2, b2 = prepare_params(w1_f32, b1_f32, w2_f32, b2_f32)

    # jit the forwards so the params stay device-resident across steps.
    fwd_single = jax.jit(policy_forward)
    fwd_batch = jax.jit(policy_forward_batch)

    # --- single-state path (matches PolicyNetwork.forward semantics) ---
    log_probs = fwd_single(state, w1, b1, w2, b2)
    jax.block_until_ready(log_probs)
    assert log_probs.shape == (num_actions,)
    assert jnp.abs(jnp.sum(jnp.exp(log_probs)) - 1.0) < 1e-3
    ref = _reference_forward(state.reshape(1, -1), w1, b1, w2, b2)[0]
    assert jnp.max(jnp.abs(log_probs - ref)) < 2e-3

    # --- small aligned batch (single block, no wrapper-side pad copy) ---
    batch_log_probs = fwd_batch(batch_states, w1, b1, w2, b2)
    jax.block_until_ready(batch_log_probs)
    assert batch_log_probs.shape == (16, num_actions)
    assert jnp.max(jnp.abs(jnp.sum(jnp.exp(batch_log_probs), axis=-1) - 1.0)) < 1e-3
    ref_b = _reference_forward(batch_states, w1, b1, w2, b2)
    assert jnp.max(jnp.abs(batch_log_probs - ref_b)) < 2e-3

    # --- larger ragged batch (multi-block "parallel" grid + tail padding) ---
    big_log_probs = fwd_batch(big_states, w1, b1, w2, b2)
    jax.block_until_ready(big_log_probs)
    assert big_log_probs.shape == (600, num_actions)
    assert jnp.max(jnp.abs(jnp.sum(jnp.exp(big_log_probs), axis=-1) - 1.0)) < 1e-3
    ref_big = _reference_forward(big_states, w1, b1, w2, b2)
    assert jnp.max(jnp.abs(big_log_probs - ref_big)) < 5e-3

    print("KERNEL_OK")
</pallas_src>

<mosaic_0001>
module attributes {stable_mosaic.version = 11 : i64} {
  func.func @policy_kernel(%arg0: i32, %arg1: memref<8x32xf32, #tpu.memory_space<vmem>>, %arg2: memref<32x32xbf16, #tpu.memory_space<vmem>>, %arg3: memref<1x32xf32, #tpu.memory_space<vmem>>, %arg4: memref<32x8xbf16, #tpu.memory_space<vmem>>, %arg5: memref<1x8xf32, #tpu.memory_space<vmem>>, %arg6: memref<8x8xf32, #tpu.memory_space<vmem>>) attributes {dimension_semantics = [#tpu.dimension_semantics<arbitrary>], iteration_bounds = array<i64: 1>, scalar_prefetch = 0 : i64, scratch_operands = 0 : i64, tpu.core_type = #tpu.core_type<tc>, window_params = [{transform_indices = @transform_0, window_bounds = array<i64: 8, 32>}, {pipeline_mode = #tpu.pipeline_mode<synchronous>, transform_indices = @transform_1, window_bounds = array<i64: 32, 32>}, {pipeline_mode = #tpu.pipeline_mode<synchronous>, transform_indices = @transform_2, window_bounds = array<i64: 1, 32>}, {pipeline_mode = #tpu.pipeline_mode<synchronous>, transform_indices = @transform_3, window_bounds = array<i64: 32, 8>}, {pipeline_mode = #tpu.pipeline_mode<synchronous>, transform_indices = @transform_4, window_bounds = array<i64: 1, 8>}, {transform_indices = @transform_5, window_bounds = array<i64: 8, 8>}]} {
    %c0 = arith.constant 0 : index
    %c0_0 = arith.constant 0 : index
    %0 = vector.load %arg1[%c0, %c0_0] : memref<8x32xf32, #tpu.memory_space<vmem>>, vector<8x32xf32>
    %1 = arith.truncf %0 : vector<8x32xf32> to vector<8x32xbf16>
    %c0_1 = arith.constant 0 : index
    %c0_2 = arith.constant 0 : index
    %2 = vector.load %arg2[%c0_1, %c0_2] : memref<32x32xbf16, #tpu.memory_space<vmem>>, vector<32x32xbf16>
    %cst = arith.constant dense<0.000000e+00> : vector<8x32xf32>
    %3 = tpu.matmul %1, %2, %cst {dimension_numbers = #tpu.dot_dimension_numbers<[1], [0], [0], [1], [0, 0, 1, 1], [], []>} : vector<8x32xbf16>, vector<32x32xbf16>, vector<8x32xf32> -> vector<8x32xf32>
    %c0_3 = arith.constant 0 : index
    %c0_4 = arith.constant 0 : index
    %4 = vector.load %arg3[%c0_3, %c0_4] : memref<1x32xf32, #tpu.memory_space<vmem>>, vector<1x32xf32>
    %5 = vector.broadcast %4 : vector<1x32xf32> to vector<8x32xf32>
    %6 = arith.addf %3, %5 : vector<8x32xf32>
    %cst_5 = arith.constant 0.000000e+00 : f32
    %7 = vector.broadcast %cst_5 : f32 to vector<8x32xf32>
    %8 = arith.maximumf %6, %7 : vector<8x32xf32>
    %9 = arith.truncf %8 : vector<8x32xf32> to vector<8x32xbf16>
    %c0_6 = arith.constant 0 : index
    %c0_7 = arith.constant 0 : index
    %10 = vector.load %arg4[%c0_6, %c0_7] : memref<32x8xbf16, #tpu.memory_space<vmem>>, vector<32x8xbf16>
    %cst_8 = arith.constant dense<0.000000e+00> : vector<8x8xf32>
    %11 = tpu.matmul %9, %10, %cst_8 {dimension_numbers = #tpu.dot_dimension_numbers<[1], [0], [0], [1], [0, 0, 1, 1], [], []>} : vector<8x32xbf16>, vector<32x8xbf16>, vector<8x8xf32> -> vector<8x8xf32>
    %c0_9 = arith.constant 0 : index
    %c0_10 = arith.constant 0 : index
    %12 = vector.load %arg5[%c0_9, %c0_10] : memref<1x8xf32, #tpu.memory_space<vmem>>, vector<1x8xf32>
    %13 = vector.broadcast %12 : vector<1x8xf32> to vector<8x8xf32>
    %14 = arith.addf %11, %13 : vector<8x8xf32>
    %cst_11 = arith.constant dense<0xFF800000> : vector<8xf32>
    %15 = vector.multi_reduction <maximumf>, %14, %cst_11 [1] : vector<8x8xf32> to vector<8xf32>
    %16 = vector.shape_cast %15 : vector<8xf32> to vector<8x1xf32>
    %17 = vector.broadcast %16 : vector<8x1xf32> to vector<8x8xf32>
    %18 = arith.subf %14, %17 : vector<8x8xf32>
    %19 = math.exp %18 : vector<8x8xf32>
    %cst_12 = arith.constant dense<0.000000e+00> : vector<8xf32>
    %20 = vector.multi_reduction <add>, %19, %cst_12 [1] : vector<8x8xf32> to vector<8xf32>
    %21 = vector.shape_cast %20 : vector<8xf32> to vector<8x1xf32>
    %22 = math.log %21 : vector<8x1xf32>
    %23 = vector.broadcast %22 : vector<8x1xf32> to vector<8x8xf32>
    %24 = arith.subf %18, %23 : vector<8x8xf32>
    %c0_13 = arith.constant 0 : index
    %c0_14 = arith.constant 0 : index
    %25 = vector.load %arg6[%c0_13, %c0_14] : memref<8x8xf32, #tpu.memory_space<vmem>>, vector<8x8xf32>
    tpu.vector_store %arg6[%c0_13, %c0_14], %24 {strides = array<i32>} : memref<8x8xf32, #tpu.memory_space<vmem>>, vector<8x8xf32>,
    return
  }
  func.func @transform_0(%arg0: i32) -> (i32, i32) {
    %c0_i32 = arith.constant 0 : i32
    %c0_i32_0 = arith.constant 0 : i32
    return %arg0, %c0_i32 : i32, i32
  }
  func.func @transform_1(%arg0: i32) -> (i32, i32) {
    %c0_i32 = arith.constant 0 : i32
    %c0_i32_0 = arith.constant 0 : i32
    %c0_i32_1 = arith.constant 0 : i32
    return %c0_i32, %c0_i32_0 : i32, i32
  }
  func.func @transform_2(%arg0: i32) -> (i32, i32) {
    %c0_i32 = arith.constant 0 : i32
    %c0_i32_0 = arith.constant 0 : i32
    %c0_i32_1 = arith.constant 0 : i32
    return %c0_i32, %c0_i32_0 : i32, i32
  }
  func.func @transform_3(%arg0: i32) -> (i32, i32) {
    %c0_i32 = arith.constant 0 : i32
    %c0_i32_0 = arith.constant 0 : i32
    %c0_i32_1 = arith.constant 0 : i32
    return %c0_i32, %c0_i32_0 : i32, i32
  }
  func.func @transform_4(%arg0: i32) -> (i32, i32) {
    %c0_i32 = arith.constant 0 : i32
    %c0_i32_0 = arith.constant 0 : i32
    %c0_i32_1 = arith.constant 0 : i32
    return %c0_i32, %c0_i32_0 : i32, i32
  }
  func.func @transform_5(%arg0: i32) -> (i32, i32) {
    %c0_i32 = arith.constant 0 : i32
    %c0_i32_0 = arith.constant 0 : i32
    return %arg0, %c0_i32 : i32, i32
  }
}

</mosaic_0001>

<bundles_post_ra>
// kernel: policy_forward.1
= control target key start
LH: loop header
LB: loop body
LE: loop exit
PB: predicated region body
PF: predicated region fallthrough
CT: control target
= control target key end

     0   :  { %v216_v0 = vmov 0.0   ;;  %vm217_vm0 = vmmov 0   ;;  %vm46_vm1 = vcmask 261120   ;;  %vm158_vm2 = vcmask 64512   ;;  %s277_s1 = inlined_call_operand.vmem [shape: bf16[32,32], index: 1, kind: input, shape index: {}]   ;;  %s278_s0 = inlined_call_operand.vmem [shape: f32[8,32], index: 0, kind: input, shape index: {}]   ;;  %s279_s3 = inlined_call_operand.vmem [shape: bf16[32,8], index: 3, kind: input, shape index: {}]   ;;  %s280_s2 = inlined_call_operand.vmem [shape: f32[1,32], index: 2, kind: input, shape index: {}]   ;;  %s281_s4 = inlined_call_operand.vmem [shape: f32[1,8], index: 4, kind: input, shape index: {}]   ;;  %s282_s5 = inlined_call_operand.vmem [shape: f32[8,8], index: 5, kind: output, shape index: {}]  }
   0x1   :  { %190 = vmatprep.subr.bf16.mxu0 %v216_v0  ;;  %v208_v1 = vld [vmem:[%s277_s1] sm:$0xff]   ;;  %194 = vmatprep.mubr.msk.bf16.mxu0 %vm217_vm0, %v216_v0  ;;  %v209_v2 = vld [vmem:[%s277_s1 + $0x8] sm:$0xff]  }
   0x2   :  { %198 = vmatprep.subr.bf16.mxu1 %v216_v0  ;;  %202 = vmatprep.mubr.msk.bf16.mxu1 %vm217_vm0, %v216_v0  ;;  %v21_v3 = vld [vmem:[%s278_s0] sm:$0xff]  ;;  %v211_v6 = vld [vmem:[%s279_s3 + $0x8] sm:$0xff]  }
   0x3   :  { %191 = vmatpush3.bf16.msra.mxu0 %v208_v1  ;;  %v22_v4 = vpack.c.bf16 %v21_v3, %v21_v3  ;;  %v210_v5 = vld [vmem:[%s279_s3] sm:$0xff]  }
   0x4   :  { %192 = vmatprep.subr.bf16.mxu0 %v216_v0  ;;  %199 = vmatpush3.bf16.msra.mxu1 %v210_v5  ;;  %v176_v7 = vld [vmem:[%s280_s2] ss:$0 sm:$0xff] }
   0x5   :  { %200 = vmatprep.subr.bf16.mxu1 %v216_v0  ;;  %v180_v15 = vld [vmem:[%s281_s4] ss:$0 sm:$0xff] }
   0x7   :  { %193 = vmatpush3.bf16.msra.mxu0 %v209_v2 }
   0x8   :  { %201 = vmatpush3.bf16.msra.mxu1 %v211_v6 }
   0xa   :  { %195 = vmatmul.mubr.msk.bf16.vlgmr.msra.gmra.mrb[0].mxu0 %vm46_vm1, %v22_v4 }
  0xdd   :  { %v84_v8 = vpop.f32.mrb[0].mxu0 }
  0xde   :  { %v85_v9 = vadd.f32 %v176_v7, %v84_v8  ;;  %v196_v10 = vpop.f32.mrb[1].mxu0 }
  0xdf   :  { %v87_v11 = vpop.f32.mrb[2].mxu0 }
  0xe0   :  { %v90_v12 = vmax.f32 %v85_v9, 0.0  ;;  %v197_v13 = vpop.f32.mrb[3].mxu0 }
  0xe2   :  { %v91_v14 = vpack.c.bf16 %v90_v12, %v90_v12 }
  0xe4   :  { %203 = vmatmul.mubr.msk.bf16.vlgmr.msra.gmra.mrb[0].mxu1 %vm46_vm1, %v91_v14 }
 0x1b7   :  { %v152_v16 = vpop.f32.mrb[0].mxu1 }
 0x1b8   :  { %v153_v17 = vadd.f32 %v180_v15, %v152_v16  ;;  %v204_v18 = vpop.f32.mrb[1].mxu1 }
 0x1b9   :  { %v155_v19 = vpop.f32.mrb[2].mxu1 }
 0x1ba   :  { %v205_v20 = vpop.f32.mrb[3].mxu1  ;;  %v159_v21 = vsel %vm158_vm2, %v153_v17, -inf }
 0x1bb   :  { %160 = vmax.xlane.f32.xlu0 %v159_v21 }
 0x248   :  { %v161_v22 = vpop.xlane.xlu0 %160 }
 0x249   :  { %v162_v23 = vsub.f32 %v153_v17, %v161_v22 }
 0x24b   :  { %v163_v24 = vmul.f32 1.442695, %v162_v23 }
 0x24d   :  { %212 = vpow2.f32 %v163_v24 }
 0x257   :  { %v213_v25 = vpop.eup %212 }
 0x258   :  { %v165_v26 = vsel %vm158_vm2, %v213_v25, 0.0 }
 0x259   :  { %166 = vadd.xlane.f32.xlu0 %v165_v26 }
 0x2e6   :  { %v167_v27 = vpop.xlane.xlu0 %166 }
 0x2e7   :  { %214 = vlog2.f32 %v167_v27 }
 0x2f1   :  { %v215_v28 = vpop.eup %214 }
 0x2f2   :  { %v169_v29 = vmul.f32 0.6931472, %v215_v28 }
 0x2f4   :  { %v170_v30 = vsub.f32 %v162_v23, %v169_v29 }
 0x2f6   :  { %171 = vst.msk [vmem:[%s282_s5] sm:$0xff] %vm158_vm2, %v170_v30 }

</bundles_post_ra>
